<compile_context>
chip_gen: v7x
topology: tpu7x:2x2x1
jax: 0.10.0
libtpu: 0.0.40
codegen_flags: <defaults>
</compile_context>

<pallas_src>
import numpy as np

import jax
import jax.numpy as jnp
from jax import lax
from jax.experimental import pallas as pl
from jax.experimental.pallas import tpu as pltpu


def _vmem_limit_bytes():
    """Half of physical VMEM: 32 MiB on v7x (64 MiB phys), 64 MiB on v5e/v6e."""
    try:
        cap = int(pltpu.get_tpu_info().vmem_capacity_bytes)
    except Exception:
        cap = 64 * 1024 * 1024  # conservative fallback (assume v7x-sized VMEM)
    return min(cap // 2, 96 * 1024 * 1024)


def _pick_tl(L, total_channels, itemsize, N, vmem_limit):
    """Largest lane tile (multiple of 128, divisor of L) fitting the VMEM budget.

    Only forces >= 2 spatial grid steps when N == 1 (needed for v7x's second
    TensorCore); otherwise the batch axis already provides parallel steps.
    """
    if L % 128 != 0:
        # Full-extent block is always legal regardless of 128-alignment.
        return L
    budget = max(vmem_limit - (4 << 20), vmem_limit // 2)
    cap = max(128, budget // (2 * total_channels * itemsize))  # x2: double-buffer
    if N == 1 and L >= 256:
        cap = min(cap, max(128, L // 2))
    if cap >= L:
        return L
    best = 128
    d = 128
    limit = min(cap, L)
    while d <= limit:
        if L % d == 0:
            best = d
        d += 128
    return best


def _rr_max(H, W):
    """Trace-time replica of torch's rr / torch.max(rr) normalizer (float32)."""
    xs = np.arange(H, dtype=np.float32)[:, None] / np.float32(H - 1) * 2 - 1
    ys = np.arange(W, dtype=np.float32)[None, :] / np.float32(W - 1) * 2 - 1
    xs = np.broadcast_to(xs, (H, W))
    ys = np.broadcast_to(ys, (H, W))
    rr = np.sqrt(xs * xs + ys * ys).astype(np.float32)
    return float(rr.max())


def _make_kernel(C, C_out, TL, W, with_r, use_boundary, sx, sy, inv_rr, out_dtype):
    w_pow2 = W > 0 and (W & (W - 1)) == 0
    shift = W.bit_length() - 1
    mask = W - 1
    inv_w = float(np.float32(1.0) / np.float32(W))

    def kernel(*refs):
        if use_boundary:
            x_ref, hm_ref, o_ref = refs
        else:
            x_ref, o_ref = refs

        t = pl.program_id(1)
        j = lax.broadcasted_iota(jnp.int32, (1, TL), 1)
        flat = t * TL + j                      # flat spatial index (row-major H,W)

        if w_pow2:
            row = flat >> shift
            col = flat & mask
        else:
            # Exact divmod via float estimate + one-step integer correction
            # (exact for H*W < 2^24; avoids vector integer division).
            ff = flat.astype(jnp.float32)
            q = jnp.floor(ff * inv_w).astype(jnp.int32)
            r = flat - q * W
            q = q + (r >= W).astype(jnp.int32) - (r < 0).astype(jnp.int32)
            row = q
            col = flat - q * W

        xc = row.astype(jnp.float32) * sx - 1.0   # varies along H
        yc = col.astype(jnp.float32) * sy - 1.0   # varies along W

        # Pass-through of the input channels (one contiguous store).
        o_ref[0, 0:C, :] = x_ref[0, :, :]

        # Build all extra channels as one stacked slab, store once.
        extras = [xc, yc]
        if with_r:
            rr = jnp.sqrt(xc * xc + yc * yc) * inv_rr
            extras.append(rr)
        if use_boundary:
            b = jnp.clip(hm_ref[0, :, :].astype(jnp.float32), 0.0, 1.0)
            m = b > 0.05
            zero = jnp.zeros_like(xc)
            extras.append(jnp.where(m, xc, zero))
            extras.append(jnp.where(m, yc, zero))
        stacked = jnp.concatenate(extras, axis=0)        # (n_extra, TL)
        o_ref[0, C:C_out, :] = stacked.astype(out_dtype)

    return kernel


def add_coords_th(x, heatmap=None, *, with_r=False, with_boundary=False):
    """Pallas implementation of AddCoordsTh.forward.  x: (N, C, H, W) NCHW."""
    N, C, H, W = x.shape
    use_boundary = with_boundary and heatmap is not None
    n_coord = 3 if with_r else 2
    C_out = C + n_coord + (2 if use_boundary else 0)
    L = H * W
    itemsize = jnp.dtype(x.dtype).itemsize

    vmem_limit = _vmem_limit_bytes()
    total_channels = C + C_out + (1 if use_boundary else 0)
    TL = _pick_tl(L, total_channels, itemsize, N, vmem_limit)
    grid = (N, L // TL)

    # Hoist all constant divides to trace time (kernel only multiplies).
    # Note: H==1 / W==1 reproduces torch's inf/nan behavior instead of erroring.
    with np.errstate(divide="ignore", invalid="ignore"):
        sx = float(np.float32(2.0) / np.float32(H - 1))
        sy = float(np.float32(2.0) / np.float32(W - 1))
        inv_rr = (float(np.float32(1.0) / np.float32(_rr_max(H, W)))
                  if with_r else 1.0)

    kernel = _make_kernel(C, C_out, TL, W, with_r, use_boundary,
                          sx, sy, inv_rr, x.dtype)

    # Lane-dense flattening of spatial dims (metadata-only reshape for x).
    x_flat = x.reshape(N, C, L)
    in_specs = [pl.BlockSpec((1, C, TL), lambda n, t: (n, 0, t))]
    args = [x_flat]
    if use_boundary:
        # Only the last heatmap channel is ever read; slice it in the wrapper
        # so the kernel DMAs exactly one channel.
        hm_flat = heatmap[:, -1:, :, :].reshape(N, 1, L)
        in_specs.append(pl.BlockSpec((1, 1, TL), lambda n, t: (n, 0, t)))
        args.append(hm_flat)

    bytes_accessed = N * L * itemsize * (C + C_out)
    if use_boundary:
        bytes_accessed += N * L * jnp.dtype(heatmap.dtype).itemsize
    cost = pl.CostEstimate(
        flops=int(N * L * (12 if with_r else 8)),
        transcendentals=int(N * L) if with_r else 0,
        bytes_accessed=int(bytes_accessed),
    )

    out_flat = pl.pallas_call(
        kernel,
        out_shape=jax.ShapeDtypeStruct((N, C_out, L), x.dtype),
        grid=grid,
        in_specs=in_specs,
        out_specs=pl.BlockSpec((1, C_out, TL), lambda n, t: (n, 0, t)),
        compiler_params=pltpu.CompilerParams(
            dimension_semantics=("parallel", "parallel"),
            vmem_limit_bytes=vmem_limit,
        ),
        cost_estimate=cost,
    )(*args)
    return out_flat.reshape(N, C_out, H, W)


# ----------------------------------------------------------------------------
# Pure-JAX reference (mirrors the PyTorch module) for correctness checking.
# ----------------------------------------------------------------------------
def add_coords_ref(x, heatmap=None, *, with_r=False, with_boundary=False):
    N, C, H, W = x.shape
    xc = jnp.broadcast_to(jnp.arange(H, dtype=jnp.float32)[:, None], (H, W))
    yc = jnp.broadcast_to(jnp.arange(W, dtype=jnp.float32)[None, :], (H, W))
    xc = xc / (H - 1) * 2 - 1
    yc = yc / (W - 1) * 2 - 1
    coords = [xc, yc]
    if with_r:
        rr = jnp.sqrt(xc * xc + yc * yc)
        rr = rr / jnp.max(rr)
        coords.append(rr)
    coords = jnp.stack(coords, axis=0)                       # (nc, H, W)
    coords = jnp.broadcast_to(coords[None], (N,) + coords.shape)
    pieces = [x, coords.astype(x.dtype)]
    if with_boundary and heatmap is not None:
        b = jnp.clip(heatmap[:, -1:], 0.0, 1.0)
        xx = jnp.where(b > 0.05, xc, 0.0)
        yy = jnp.where(b > 0.05, yc, 0.0)
        pieces += [xx.astype(x.dtype), yy.astype(x.dtype)]
    return jnp.concatenate(pieces, axis=1)


# ----------------------------------------------------------------------------
if __name__ == "__main__":
    key = jax.random.PRNGKey(0)
    kx, kh = jax.random.split(key)

    # Small shapes consistent with the module: batch=2, channels=4, 16x16 spatial.
    x = jax.random.normal(kx, (2, 4, 16, 16), jnp.float32)
    heatmap = jax.random.uniform(kh, (2, 5, 16, 16), jnp.float32,
                                 minval=-0.5, maxval=1.5)

    # Full path: with_r=True, with_boundary=True, heatmap provided.
    out = add_coords_th(x, heatmap, with_r=True, with_boundary=True)
    out = jax.block_until_ready(out)
    assert out.shape == (2, 4 + 3 + 2, 16, 16), out.shape
    ref = jax.block_until_ready(
        add_coords_ref(x, heatmap, with_r=True, with_boundary=True)
    )
    np.testing.assert_allclose(np.asarray(out), np.asarray(ref),
                               rtol=1e-5, atol=1e-5)

    # No-boundary path (heatmap=None), with_r=True.
    out2 = add_coords_th(x, with_r=True, with_boundary=False)
    out2 = jax.block_until_ready(out2)
    assert out2.shape == (2, 4 + 3, 16, 16), out2.shape
    ref2 = jax.block_until_ready(add_coords_ref(x, with_r=True))
    np.testing.assert_allclose(np.asarray(out2), np.asarray(ref2),
                               rtol=1e-5, atol=1e-5)

    # Basic path: no r, no boundary.
    out3 = add_coords_th(x)
    out3 = jax.block_until_ready(out3)
    assert out3.shape == (2, 4 + 2, 16, 16), out3.shape
    ref3 = jax.block_until_ready(add_coords_ref(x))
    np.testing.assert_allclose(np.asarray(out3), np.asarray(ref3),
                               rtol=1e-5, atol=1e-5)

    assert bool(jnp.isfinite(out).all())
    print("KERNEL_OK")
</pallas_src>

<mosaic_0001>
module attributes {stable_mosaic.version = 11 : i64} {
  func.func @kernel(%arg0: i32, %arg1: i32, %arg2: memref<1x4x256xf32, #tpu.memory_space<vmem>>, %arg3: memref<1x1x256xf32, #tpu.memory_space<vmem>>, %arg4: memref<1x9x256xf32, #tpu.memory_space<vmem>>) attributes {dimension_semantics = [#tpu.dimension_semantics<parallel>, #tpu.dimension_semantics<parallel>], iteration_bounds = array<i64: 2, 1>, scalar_prefetch = 0 : i64, scratch_operands = 0 : i64, tpu.core_type = #tpu.core_type<tc>, window_params = [{transform_indices = @transform_0, window_bounds = array<i64: 1, 4, 256>}, {transform_indices = @transform_1, window_bounds = array<i64: 1, 1, 256>}, {transform_indices = @transform_2, window_bounds = array<i64: 1, 9, 256>}]} {
    %0 = tpu.iota {dimensions = array<i32: 1>} : vector<1x256xi32>
    %c256_i32 = arith.constant 256 : i32
    %1 = arith.muli %arg1, %c256_i32 : i32
    %2 = vector.broadcast %1 : i32 to vector<1x256xi32>
    %3 = arith.addi %2, %0 : vector<1x256xi32>
    %c4_i32 = arith.constant 4 : i32
    %4 = vector.broadcast %c4_i32 : i32 to vector<1x256xi32>
    %5 = arith.shrsi %3, %4 : vector<1x256xi32>
    %c15_i32 = arith.constant 15 : i32
    %6 = vector.broadcast %c15_i32 : i32 to vector<1x256xi32>
    %7 = arith.andi %3, %6 : vector<1x256xi32>
    %8 = arith.sitofp %5 : vector<1x256xi32> to vector<1x256xf32>
    %cst = arith.constant 0.13333334 : f32
    %9 = vector.broadcast %cst : f32 to vector<1x256xf32>
    %10 = arith.mulf %8, %9 : vector<1x256xf32>
    %cst_0 = arith.constant 1.000000e+00 : f32
    %11 = vector.broadcast %cst_0 : f32 to vector<1x256xf32>
    %12 = arith.subf %10, %11 : vector<1x256xf32>
    %13 = arith.sitofp %7 : vector<1x256xi32> to vector<1x256xf32>
    %cst_1 = arith.constant 0.13333334 : f32
    %14 = vector.broadcast %cst_1 : f32 to vector<1x256xf32>
    %15 = arith.mulf %13, %14 : vector<1x256xf32>
    %cst_2 = arith.constant 1.000000e+00 : f32
    %16 = vector.broadcast %cst_2 : f32 to vector<1x256xf32>
    %17 = arith.subf %15, %16 : vector<1x256xf32>
    %c0 = arith.constant 0 : index
    %c0_3 = arith.constant 0 : index
    %c0_4 = arith.constant 0 : index
    %18 = vector.load %arg2[%c0, %c0_3, %c0_4] : memref<1x4x256xf32, #tpu.memory_space<vmem>>, vector<1x4x256xf32>
    %19 = vector.shape_cast %18 : vector<1x4x256xf32> to vector<4x256xf32>
    %c0_5 = arith.constant 0 : index
    %c0_6 = arith.constant 0 : index
    %c0_7 = arith.constant 0 : index
    %20 = vector.load %arg4[%c0_5, %c0_6, %c0_7] : memref<1x9x256xf32, #tpu.memory_space<vmem>>, vector<1x4x256xf32>
    %21 = vector.shape_cast %20 : vector<1x4x256xf32> to vector<4x256xf32>
    %22 = vector.shape_cast %19 : vector<4x256xf32> to vector<1x4x256xf32>
    tpu.vector_store %arg4[%c0_5, %c0_6, %c0_7], %22 {strides = array<i32>} : memref<1x9x256xf32, #tpu.memory_space<vmem>>, vector<1x4x256xf32>,
    %23 = arith.mulf %12, %12 : vector<1x256xf32>
    %24 = arith.mulf %17, %17 : vector<1x256xf32>
    %25 = arith.addf %23, %24 : vector<1x256xf32>
    %26 = math.sqrt %25 : vector<1x256xf32>
    %cst_8 = arith.constant 0.707106769 : f32
    %27 = vector.broadcast %cst_8 : f32 to vector<1x256xf32>
    %28 = arith.mulf %26, %27 : vector<1x256xf32>
    %c0_9 = arith.constant 0 : index
    %c0_10 = arith.constant 0 : index
    %c0_11 = arith.constant 0 : index
    %29 = vector.load %arg3[%c0_9, %c0_10, %c0_11] : memref<1x1x256xf32, #tpu.memory_space<vmem>>, vector<1x1x256xf32>
    %30 = vector.shape_cast %29 : vector<1x1x256xf32> to vector<1x256xf32>
    %cst_12 = arith.constant 0.000000e+00 : f32
    %cst_13 = arith.constant 1.000000e+00 : f32
    %31 = vector.broadcast %cst_12 : f32 to vector<1x256xf32>
    %32 = arith.maximumf %31, %30 : vector<1x256xf32>
    %33 = vector.broadcast %cst_13 : f32 to vector<1x256xf32>
    %34 = arith.minimumf %33, %32 : vector<1x256xf32>
    %cst_14 = arith.constant 5.000000e-02 : f32
    %35 = vector.broadcast %cst_14 : f32 to vector<1x256xf32>
    %36 = arith.cmpf ogt, %34, %35 : vector<1x256xf32>
    %cst_15 = arith.constant 0.000000e+00 : f32
    %37 = vector.broadcast %cst_15 : f32 to vector<1x256xf32>
    %38 = arith.select %36, %12, %37 : vector<1x256xi1>, vector<1x256xf32>
    %39 = arith.select %36, %17, %37 : vector<1x256xi1>, vector<1x256xf32>
    %40 = tpu.concatenate %12, %17, %28, %38, %39 in 0 : vector<1x256xf32>, vector<1x256xf32>, vector<1x256xf32>, vector<1x256xf32>, vector<1x256xf32> -> vector<5x256xf32>
    %c0_16 = arith.constant 0 : index
    %c4 = arith.constant 4 : index
    %c0_17 = arith.constant 0 : index
    %41 = vector.load %arg4[%c0_16, %c4, %c0_17] : memref<1x9x256xf32, #tpu.memory_space<vmem>>, vector<1x5x256xf32>
    %42 = vector.shape_cast %41 : vector<1x5x256xf32> to vector<5x256xf32>
    %43 = vector.shape_cast %40 : vector<5x256xf32> to vector<1x5x256xf32>
    tpu.vector_store %arg4[%c0_16, %c4, %c0_17], %43 {strides = array<i32>} : memref<1x9x256xf32, #tpu.memory_space<vmem>>, vector<1x5x256xf32>,
    return
  }
  func.func @transform_0(%arg0: i32, %arg1: i32) -> (i32, i32, i32) {
    %c0_i32 = arith.constant 0 : i32
    %c0_i32_0 = arith.constant 0 : i32
    return %arg0, %c0_i32, %arg1 : i32, i32, i32
  }
  func.func @transform_1(%arg0: i32, %arg1: i32) -> (i32, i32, i32) {
    %c0_i32 = arith.constant 0 : i32
    %c0_i32_0 = arith.constant 0 : i32
    return %arg0, %c0_i32, %arg1 : i32, i32, i32
  }
  func.func @transform_2(%arg0: i32, %arg1: i32) -> (i32, i32, i32) {
    %c0_i32 = arith.constant 0 : i32
    %c0_i32_0 = arith.constant 0 : i32
    return %arg0, %c0_i32, %arg1 : i32, i32, i32
  }
}

</mosaic_0001>

<bundles_post_ra>
// kernel: tpu_custom_call.1
= control target key start
LH: loop header
LB: loop body
LE: loop exit
PB: predicated region body
PF: predicated region fallthrough
CT: control target
= control target key end

     0   :  { %7 = vsyncpa [#allocation3], 0  ;;  %s894_s0 = inlined_call_operand.hbm [shape: f32[2,4,256], index: 0, kind: input, shape index: {}]   ;;  %s895_s1 = inlined_call_operand.hbm [shape: f32[2,1,256], index: 1, kind: input, shape index: {}]   ;;  %s896_s2 = inlined_call_operand.vmem [shape: f32[2,9,256], index: 2, kind: output, shape index: {}]  }
   0x1   :  { %9 = vsyncpa [#allocation3 + $0x1], 0 }
   0x2   :  { %10 = vsyncpa [#allocation5], 0 }
   0x3   :  { %12 = vsyncpa [#allocation5 + $0x1], 0  ;;  %s715_s9 = smov 0   ;;  %s717_s10 = smov 0  }
   0x4   :  { %s719_s11 = smov 0   ;;  %s721_s12 = smov 0  }
   0x5   :  { %s723_s13 = smov 0   ;;  %s725_s14 = smov 0  }
   0x6 LB: > { %s491_s15 = sadd.s32 4294967295, %s695_s14   ;;  %s30_s16 = sadd.s32 1, %s691_s13  ;;  %s695_s14 = sphi %s725_s14, %s18_s14   ;;  %s691_s13 = sphi %s723_s13, %s910_s13   ;;  %s687_s12 = sphi %s721_s12, %s909_s12   ;;  %s683_s11 = sphi %s719_s11, %s908_s11   ;;  %s679_s10 = sphi %s717_s10, %s907_s10   ;;  %s675_s9 = sphi %s715_s9, %s906_s9  }
   0x7   : > { %p32_p0 = scmp.ge.s32.totalorder %s30_s16, 2  ;;  %s39_s17 = sadd.s32 1, %s683_s11 }
   0x8   : > { %p46_p1 = scmp.ne.s32.totalorder %s683_s11, %s679_s10  ;;  %p47_p2 = scmp.eq.s32.totalorder %s695_s14, 0 }
   0x9   : > { %s912_s16 = smov (%p32_p0, %s30_s16), 0  ;;  %p52_p4 = scmp.ne.s32.totalorder %s679_s10, %s675_s9 }
   0xa   : > { %p751_p3 = por %p47_p2, %p46_p1  ;;  %s34_s19 = ssub.s32 %s691_s13, %s912_s16 }
   0xb   : > { %p53_p5 = scmp.eq.s32.totalorder %s491_s15, 0  ;;  %p37_p6 = scmp.eq.s32.totalorder %s34_s19, 0 }
   0xc   : > { %p526_p8 = scmp.lt.s32.totalorder %s695_s14, 2  ;;  %s767_s22 = sand.u32 1, %s683_s11  }
   0xd   : > { %p758_p7 = por %p53_p5, %p52_p4  ;;  %s512_s23 = sshll.u32 %s691_s13, 7 }
   0xe   : > { %s764_s21 = scalar_select %p37_p6, %s683_s11, %s39_s17  }
   0xf   : > { %s899_s20 = scalar_select %p758_p7, 1, 0 }
  0x10   : > { %s495_s24 = sshll.u32 %s767_s22, 3  ;;  %s774_s27 = scalar_lea.hbm %s894_s0, %s512_s23 }
  0x11   : > { %s136_s28 = scalar_lea.vmem [#allocation2], %s495_s24  ;;  %p778_p9 = pnand %p526_p8, %p751_p3 }
  0x12   : > { %s146_s29 = sshll.u32 %s136_s28, 4  ;;  %s133_s3 = scalar_lea.sflag [#allocation3], %s767_s22  ;;  %s782_s29 = int_to_ptr.vmem [resolvable:$true] %s146_s29 }
  0x13   : > { %s581_s4 = scalar_lea.hbm %s774_s27, 128  ;;  %p583_p13 = pneg %p778_p9 }
  0x14   : > { %p582_p12 = scmp.ne.s32.totalorder %s774_s27, %s581_s4  ;;  %s586_s7 = scalar_lea.hbm %s894_s0, 256 }
  0x15   : > { %p587_p2 = scmp.lt.u32.totalorder %s774_s27, %s894_s0  ;;  %p588_p3 = scmp.lt.u32.totalorder %s586_s7, %s581_s4 }
  0x16   : > { %p584_p0 = pnand %p583_p13, %p582_p12  ;;  %p590_p5 = scmp.lt.u32.totalorder %s581_s4, %s774_s27 }
  0x17   : > { %p589_p4 = por %p588_p3, %p587_p2 }
  0x18   : > { %p585_p1 = pneg %p584_p0 }
  0x19   : > { %p591_p6 = por %p590_p5, %p589_p4 }
  0x1b   : > { %p592_p8 = pnand %p591_p6, %p585_p1 }
  0x1d   : > { %595 = shalt.err (!%p592_p8)
}
  0x1e   : > { %s596_s15 = scalar_lea.vmem %s782_s29, 128  ;;  %s697_s17 = smov [#allocation2]  }
  0x1f   : > { %p597_p12 = scmp.ne.s32.totalorder %s782_s29, %s596_s15  ;;  %s601_s18 = sshll.u32 %s697_s17, 4  ;;  %s602_s18 = int_to_ptr.vmem [resolvable:$false] %s601_s18 }
  0x20   : > { %s603_s19 = scalar_lea.vmem %s602_s18, 256  ;;  %p604_p11 = scmp.lt.s32.totalorder %s782_s29, %s602_s18 }
  0x21   : > { %p599_p0 = pnand %p597_p12, %p583_p13  ;;  %p605_p2 = scmp.lt.s32.totalorder %s603_s19, %s596_s15 }
  0x23   : > { %p600_p10 = pneg %p599_p0  ;;  %p606_p3 = por %p605_p2, %p604_p11 }
  0x25   : > { %p607_p4 = pnand %p606_p3, %p600_p10 }
  0x27   : > { %610 = shalt.err (!%p607_p4)
}
  0x28   : > { %522 = dma.hbm_to_vmem [thread:$0]  (!%p778_p9), %s774_s27, 128, %s782_s29, %s133_s3  }
  0x29   : > { %p901_p1 = scmp.lt.s32.totalorder %s695_s14, 3  ;;  %p902_p5 = scmp.ge.s32.totalorder %s695_s14, 1 }
  0x2a   : > { %s498_s24 = sshll.u32 %s767_s22, 1  ;;  %s513_s25 = sshll.u32 %s691_s13, 5 }
  0x2b   : > { %p816_p6 = pnand %p902_p5, %p901_p1  ;;  %s825_s4 = scalar_lea.hbm %s895_s1, %s513_s25 }
  0x2c   : > { %s157_s5 = scalar_lea.vmem [#allocation4], %s498_s24  ;;  %s154_s27 = scalar_lea.sflag [#allocation5], %s767_s22 }
  0x2d   : > { %s903_s23 = scalar_select %p816_p6, 1, 0 }
  0x2e   : > { %s167_s6 = sshll.u32 %s157_s5, 4  ;;  %s611_s29 = scalar_lea.hbm %s825_s4, 32  ;;  %s168_s6 = int_to_ptr.vmem [resolvable:$true] %s167_s6 }
  0x2f   : > { %p612_p10 = scmp.ne.s32.totalorder %s825_s4, %s611_s29  ;;  %s616_s8 = scalar_lea.hbm %s895_s1, 64 }
  0x30   : > { %p617_p12 = scmp.lt.u32.totalorder %s825_s4, %s895_s1  ;;  %p618_p0 = scmp.lt.u32.totalorder %s616_s8, %s611_s29 }
  0x31   : > { %p614_p11 = pnand %p612_p10, %p583_p13  ;;  %p620_p3 = scmp.lt.u32.totalorder %s611_s29, %s825_s4 }
  0x32   : > { %p619_p2 = por %p618_p0, %p617_p12 }
  0x33   : > { %p615_p8 = pneg %p614_p11 }
  0x34   : > { %p621_p4 = por %p620_p3, %p619_p2 }
  0x36   : > { %p622_p1 = pnand %p621_p4, %p615_p8 }
  0x38   : > { %625 = shalt.err (!%p622_p1)
}
  0x39   : > { %s626_s22 = scalar_lea.vmem %s168_s6, 32  ;;  %s698_s17 = smov [#allocation4]  }
  0x3a   : > { %p627_p5 = scmp.ne.s32.totalorder %s168_s6, %s626_s22  ;;  %s631_s18 = sshll.u32 %s698_s17, 4  ;;  %s632_s18 = int_to_ptr.vmem [resolvable:$false] %s631_s18 }
  0x3b   : > { %s633_s19 = scalar_lea.vmem %s632_s18, 64  ;;  %p634_p7 = scmp.lt.s32.totalorder %s168_s6, %s632_s18 }
  0x3c   : > { %p629_p10 = pnand %p627_p5, %p583_p13  ;;  %p635_p6 = scmp.lt.s32.totalorder %s633_s19, %s626_s22 }
  0x3e   : > { %p630_p11 = pneg %p629_p10  ;;  %p636_p0 = por %p635_p6, %p634_p7 }
  0x40   : > { %p637_p12 = pnand %p636_p0, %p630_p11 }
  0x42   : > { %640 = shalt.err (!%p637_p12)
}
  0x43   : > { %525 = dma.hbm_to_vmem [thread:$0]  (!%p778_p9), %s825_s4, 32, %s168_s6, %s154_s27  }
  0x44   : > { %p904_p8 = scmp.ne.s32.totalorder %s903_s23, 0 }
  0x45   : > { %s178_s24 = sand.u32 (!%p904_p8), 1, %s679_s10   ;;  %p905_p13 = scmp.ne.s32.totalorder (!%p904_p8), %s899_s20, 0 }
  0x46   : > { %176 = sbr.rel (%p904_p8) target bundleno = 122 (0x7a), region = 28  ;;  %s502_s25 = sshll.u32 (!%p904_p8), %s178_s24, 3 }
  0x47   : > { %s179_s26 = scalar_lea.sflag (!%p904_p8), [#allocation3], %s178_s24  ;;  %s182_s28 = scalar_lea.vmem (!%p904_p8), [#allocation2], %s502_s25 }
  0x4d   : > { %666 = dma.done.wait (%p905_p13), %s179_s26, 128  }
  0x4e   : > { %668 = vsyncadd (%p905_p13), %s179_s26, 4294967168  ;;  %s503_s5 = sshll.u32 %s178_s24, 1  ;;  %s188_s29 = scalar_lea.sflag [#allocation5], %s178_s24 }
  0x4f   : > { %s854_s30 = scalar_lea.vmem [#allocation4], %s503_s5 }
  0x50   : > { %670 = dma.done.wait (%p905_p13), %s188_s29, 32  }
  0x51   : > { %672 = vsyncadd (%p905_p13), %s188_s29, 4294967264  ;;  %p224_p7 = scmp.lt.s32.totalorder %s687_s12, 1  ;;  %v233_v0 = vlaneseq  ;;  %v256_v9 = vld [vmem:[%s182_s28] sm:$0xff]  ;;  %v699_v10 = vmov 1966171168   ;;  %vm348_vm1 = vcmask 1040384  }
  0x52   : > { %v292_v11 = vunpack.c.l.s4 %v699_v10  ;;  %v258_v12 = vcombine.high %v256_v9, %v256_v9  ;;  %v284_v29 = vld [vmem:[%s854_s30] sm:$0x3]  ;;  %vm351_vm6 = vcmask 1041408   ;;  %vm354_vm7 = vcmask 1042432  }
  0x53   : > { %s914_s12 = smov (!%p224_p7, %s687_s12), 1  ;;  %v234_v1 = vand.u32 127, %v233_v0  ;;  %v295_v21 = vshrl.u32 %v233_v0, 7  ;;  %v285_v34 = vmax.f32 %v284_v29, 0.0  ;;  %vm357_vm8 = vcmask 1043456  }
  0x54   : > { %s514_s23 = sshll.u32 %s914_s12, 5  ;;  %v293_v25 = vunpack.c.0.s8 %v292_v11 }
  0x55   : > { %v235_v2 = vadd.s32 128, %v234_v1  ;;  %v240_v3 = vshra.s32 %v234_v1, 4  ;;  %v242_v4 = vand.u32 15, %v234_v1  ;;  %s865_s27 = scalar_lea.vmem %s896_s2, %s514_s23  ;;  %v286_v37 = vmin.f32 %v285_v34, 1.0 }
  0x56   : > { %260 = vst [vmem:[%s865_s27] sm:$0xf] %v256_v9  ;;  %261 = vst [vmem:[%s865_s27 + $0x8] sm:$0xf] %v258_v12  ;;  %v296_v33 = vsub.s32 %v293_v25, %v295_v21  ;;  %v329_v41 = vsub.s32 0, %v295_v21  ;;  %v333_v44 = vsub.s32 1, %v295_v21 }
  0x57   : > { %v241_v5 = vshra.s32 %v235_v2, 4  ;;  %v243_v6 = vand.u32 15, %v235_v2  ;;  %v244_v7 = vcvt.s32.f32 %v240_v3  ;;  %v250_v8 = vcvt.s32.f32 %v242_v4 }
  0x58   : > { %vm287_vm0 = vcmp.gt.f32.partialorder %v286_v37, 0.05 }
  0x59   : > { %v245_v13 = vcvt.s32.f32 %v241_v5  ;;  %v246_v14 = vmul.f32 0.13333334, %v244_v7  ;;  %v251_v15 = vcvt.s32.f32 %v243_v6  ;;  %v252_v16 = vmul.f32 0.13333334, %v250_v8 }
  0x5b   : > { %v247_v17 = vmul.f32 0.13333334, %v245_v13  ;;  %v506_v18 = vadd.f32 -1.0, %v246_v14  ;;  %v253_v19 = vmul.f32 0.13333334, %v251_v15  ;;  %v508_v20 = vadd.f32 -1.0, %v252_v16 }
  0x5d   : > { %v507_v22 = vadd.f32 -1.0, %v247_v17  ;;  %v509_v23 = vadd.f32 -1.0, %v253_v19  ;;  %v262_v24 = vmul.f32 %v506_v18, %v506_v18  ;;  %v264_v26 = vmul.f32 %v508_v20, %v508_v20 }
  0x5e   : > { %v349_v52 = vsel %vm348_vm1, %v506_v18, %v508_v20 }
  0x5f   : > { %v263_v27 = vmul.f32 %v507_v22, %v507_v22  ;;  %v265_v28 = vmul.f32 %v509_v23, %v509_v23  ;;  %v266_v30 = vadd.f32 %v264_v26, %v262_v24  ;;  %v290_v32 = vcombine.low %v506_v18, %v507_v22 }
  0x60   : > { %v309_v35 = vcombine.low %v508_v20, %v509_v23  ;;  %v350_v56 = vsel %vm348_vm1, %v507_v22, %v509_v23 }
  0x61   : > { %v267_v31 = vadd.f32 %v265_v28, %v263_v27  ;;  %577 = vrsqrt.f32 %v266_v30  ;;  %v297_v36 = vrot.slane %v290_v32, %v296_v33  ;;  %vm270_vm2 = vcmp.eq.f32.partialorder %v266_v30, inf }
  0x62   : > { %v316_v38 = vrot.slane %v309_v35, %v296_v33  ;;  %vm272_vm3 = vcmp.eq.f32.partialorder %v266_v30, 0.0  ;;  %v273_v43 = vand.u32 2147483648, %v266_v30 }
  0x63   : > { %579 = vrsqrt.f32 %v267_v31  ;;  %v304_v39 = vrot.slane %v297_v36, %v296_v33  ;;  %vm277_vm4 = vcmp.eq.f32.partialorder %v267_v31, inf  ;;  %v280_v48 = vand.u32 2147483648, %v267_v31 }
  0x64   : > { %v323_v40 = vrot.slane %v316_v38, %v296_v33  ;;  %vm279_vm5 = vcmp.eq.f32.partialorder %v267_v31, 0.0 }
  0x65   : > { %v306_v47 = vsel %vm287_vm0, %v304_v39, 0.0 }
  0x66   : > { %v325_v49 = vsel %vm287_vm0, %v323_v40, 0.0  ;;  %v330_v54 = vrot.slane %v306_v47, %v329_v41  ;;  %v334_v60 = vrot.slane %v306_v47, %v333_v44 }
  0x67   : > { %v341_v58 = vrot.slane %v325_v49, %v329_v41  ;;  %v345_v62 = vrot.slane %v325_v49, %v333_v44 }
  0x6b   : > { %v578_v42 = vpop.eup %577 }
  0x6c   : > { %v269_v46 = vmul.f32 %v578_v42, %v266_v30 }
  0x6d   : > { %v580_v45 = vpop.eup %579 }
  0x6e   : > { %v276_v50 = vmul.f32 %v580_v45, %v267_v31  ;;  %v271_v51 = vsel %vm270_vm2, %v266_v30, %v269_v46 }
  0x6f   : > { %v274_v53 = vsel %vm272_vm3, %v273_v43, %v271_v51 }
  0x70   : > { %v278_v55 = vsel %vm277_vm4, %v267_v31, %v276_v50  ;;  %v282_v57 = vmul.f32 0.70710677, %v274_v53 }
  0x71   : > { %v281_v59 = vsel %vm279_vm5, %v280_v48, %v278_v55 }
  0x72   : > { %v283_v61 = vmul.f32 0.70710677, %v281_v59  ;;  %v352_v63 = vsel %vm351_vm6, %v349_v52, %v282_v57 }
  0x73   : > { %v355_v0 = vsel %vm354_vm7, %v352_v63, %v330_v54 }
  0x74   : > { %v353_v1 = vsel %vm351_vm6, %v350_v56, %v283_v61  ;;  %v358_v2 = vsel %vm357_vm8, %v355_v0, %v341_v58 }
  0x75   : > { %v356_v3 = vsel %vm354_vm7, %v353_v1, %v334_v60  ;;  %v362_v4 = vrot.slane %v358_v2, 4 }
  0x76   : > { %v359_v5 = vsel %vm357_vm8, %v356_v3, %v345_v62 }
  0x77   : > { %v363_v6 = vrot.slane %v359_v5, 4  ;;  %366 = vst [vmem:[%s865_s27 + $0x10] ss:$-12 sps:$4 sm:$0xf1] %v362_v4  }
  0x79   : > { %367 = vst [vmem:[%s865_s27 + $0x18] ss:$-12 sps:$4 sm:$0xf1] %v363_v6  }
  0x7a PF: > { %s18_s14 = sadd.s32 1, %s695_s14   ;;  %s906_s9 = smov %s679_s10 }
  0x7b   : > { %p15_p9 = scmp.ge.s32.totalorder %s18_s14, 4   ;;  %s907_s10 = smov %s683_s11 }
  0x7c   : > { %s908_s11 = smov %s764_s21  ;;  %s909_s12 = smov %s691_s13 }
  0x7d   : > { %s910_s13 = smov %s912_s16  ;;  %17 = sbr.rel (!%p15_p9) target bundleno = 6 (0x6), region = 81 }
  0x84   :  { %400 = vsyncpa [#allocation3], 1 }
  0x85   :  { %402 = vsyncpa [#allocation3 + $0x1], 1 }
  0x86   :  { %403 = vsyncpa [#allocation5], 1 }
  0x87   :  { %405 = vsyncpa [#allocation5 + $0x1], 1 }

</bundles_post_ra>
